<compile_context>
chip_gen: v7x
topology: tpu7x:2x2x1
jax: 0.10.0
libtpu: 0.0.40
codegen_flags: <defaults>
</compile_context>

<pallas_src>
from functools import partial

import jax
import jax.numpy as jnp
from jax.experimental import pallas as pl
from jax.experimental.pallas import tpu as pltpu

LANE = 128
NEG_INF = -1e30


def _slab_layout(D, L):
    """Row offsets of each block inside the packed (R, 128) weight slab."""
    def up8(r):
        return (r + 7) // 8 * 8
    lay = {}
    lay["vec"] = 0                       # 9 + L small (1,128) rows
    r = up8(9 + L)
    lay["w1"] = r                        # (D,128): GDC linear * bn1 scale
    r = up8(r + D)
    lay["wg"] = r                        # (D,128): [wg | wg@a_dst | wg@a_src]
    r = up8(r + D)
    lay["wih"] = r                       # (L*D,128): LSTM W_ih, gates [i|o|g]
    r = up8(r + L * D)
    lay["wm1"] = r                       # (D,128): MLP layer 1
    r = up8(r + D)
    lay["wm2"] = r                       # (128,128): MLP layer 2 (padded)
    r = up8(r + LANE)
    lay["rows"] = r
    return lay


def lstm_gdc_kernel(x_ref, a_ref, w_ref, out_ref, *, hidden_dim, num_layers):
    D = hidden_dim
    L = num_layers
    lay = _slab_layout(D, L)

    x = x_ref[...]                              # (N, D) node features
    a = a_ref[...]                              # (N, N) raw adjacency + self-loops

    # ---- packed small vectors (one aligned load, value-level slices) ----
    pv = w_ref[0:lay["w1"], :]
    b1s = pv[0:1, :D]                           # b1 * s1 (bn1 scale folded)
    t1 = pv[1:2, :D]                            # bn1 shift
    bg = pv[2:3, :D]                            # GAT bias
    s2 = pv[3:4, :D]                            # bn2 scale
    t2 = pv[4:5, :D]                            # bn2 shift
    bm1 = pv[5:6, :]                            # (1,128) zero-padded
    bm2 = pv[6:7, :]                            # (1,128) NEG_INF-padded
    ga = pv[7:8, :]                             # LSTM post-tanh FMA mult
    gb = pv[8:9, :]                             # LSTM post-tanh FMA add

    w1s = w_ref[lay["w1"]:lay["w1"] + D, :][:, :D]        # (D, D)
    wg_ext = w_ref[lay["wg"]:lay["wg"] + D, :]            # (D, 128)
    wm1 = w_ref[lay["wm1"]:lay["wm1"] + D, :]             # (D, 128)
    wm2 = w_ref[lay["wm2"]:lay["wm2"] + LANE, :]          # (128, 128)

    # ---- in-kernel symmetric normalization: D^{-1/2} A D^{-1/2} ----
    deg = jnp.sum(a, axis=0, keepdims=True)               # (1,N) source out-degree
    dis = jnp.where(deg > 0.0, jax.lax.rsqrt(deg), 0.0)
    mgdc = a * dis * jnp.transpose(dis)                   # norm[i,j]=dis[i]*dis[j]

    # ---- GraphDiffusionConv: Linear -> normalized aggregation; BN1 + ReLU ----
    h = jnp.dot(x, w1s, preferred_element_type=jnp.float32) + b1s
    h = jnp.dot(mgdc, h, preferred_element_type=jnp.float32) + t1
    h = jnp.maximum(h, 0.0)                               # dropout: eval no-op

    # ---- GATConv (1 head, self-loops, negative_slope=0.2), fused scores ----
    t = jnp.dot(h, wg_ext, preferred_element_type=jnp.float32)   # (N, 128)
    xg = t[:, :D]                                         # W x
    a_d = t[:, D:D + 1]                                   # target score (N,1)
    a_s = t[:, D + 1:D + 2]                               # source score (N,1)
    e = a_d + jnp.transpose(a_s)                          # e[i,j]: edge j -> i
    e = jnp.where(e > 0, e, 0.2 * e)                      # LeakyReLU(0.2)
    e = jnp.where(a > 0.0, e, NEG_INF)                    # mask from adjacency
    e = e - jnp.max(e, axis=-1, keepdims=True)
    p_att = jnp.exp(e)
    rsum = jnp.sum(p_att, axis=-1, keepdims=True)
    h = (jnp.dot(p_att, xg, preferred_element_type=jnp.float32)
         * pl.reciprocal(rsum, approx=True) + bg)         # deferred softmax norm
    h = jnp.maximum(h * s2 + t2, 0.0)                     # BN2 + ReLU

    # ---- 4-layer LSTM, seq_len=1, h0=c0=0; gates [i|o|g], f-gate dropped ----
    # sigmoid(x) = 0.5*tanh(x/2)+0.5: i/o columns pre-scaled by 0.5 at pack
    # time, so one tanh over the whole gate slab + one FMA recovers all gates.
    for l in range(L):
        wih_l = w_ref[lay["wih"] + l * D:lay["wih"] + (l + 1) * D, :]
        gates = (jnp.dot(h, wih_l, preferred_element_type=jnp.float32)
                 + pv[9 + l:10 + l, :])
        u = ga * jnp.tanh(gates) + gb
        i_g = u[:, 0:D]
        o_g = u[:, D:2 * D]
        g_g = u[:, 2 * D:3 * D]
        h = o_g * jnp.tanh(i_g * g_g)                     # c_prev = 0

    # ---- MLP head + log_softmax, lane-dense 128-wide padded slab ----
    z = jnp.maximum(jnp.dot(h, wm1, preferred_element_type=jnp.float32) + bm1, 0.0)
    z = jnp.dot(z, wm2, preferred_element_type=jnp.float32) + bm2
    z = z - jnp.max(z, axis=-1, keepdims=True)
    out_ref[...] = z - jnp.log(jnp.sum(jnp.exp(z), axis=-1, keepdims=True))


@partial(jax.jit, static_argnames=("out_dim", "num_layers"))
def lstm_gdc_forward(x, edge_index, slab, out_dim, num_layers):
    """Build the raw self-looped adjacency (data-dependent scatter only) and
    run the fused kernel; normalization happens inside the kernel."""
    N, D = x.shape

    # add self-loops (both GraphDiffusionConv and GATConv do this)
    loops = jnp.arange(N, dtype=edge_index.dtype)
    src = jnp.concatenate([edge_index[0], loops])
    dst = jnp.concatenate([edge_index[1], loops])
    # A[i, j] = multiplicity of edge j (source) -> i (target)
    A = jnp.zeros((N, N), jnp.float32).at[dst, src].add(1.0)

    kernel = partial(lstm_gdc_kernel, hidden_dim=D, num_layers=num_layers)
    out_p = pl.pallas_call(
        kernel,
        out_shape=jax.ShapeDtypeStruct((N, LANE), jnp.float32),
        in_specs=[pl.BlockSpec(memory_space=pltpu.MemorySpace.VMEM)] * 3,
        out_specs=pl.BlockSpec(memory_space=pltpu.MemorySpace.VMEM),
        # single tiny graph -> single grid point; batching multiple graphs on a
        # leading "parallel" grid axis is the way to use v7x's 2nd TensorCore.
    )(x, A, slab)
    return out_p[:, :out_dim]


def pack_params(p, D, out_dim, num_layers):
    """Pack ALL static parameters into one lane-dense (R,128) f32 slab.

    Folds bn1 scale into the GDC linear, fuses the GAT attention vectors into
    the GAT linear, drops the dead forget gate, reorders LSTM gates to
    [i|o|g] with i/o pre-scaled by 0.5 (sigmoid-via-tanh), and pads the MLP
    head to 128 lanes (NEG_INF bias pad keeps log_softmax exact)."""
    assert D % 8 == 0, "hidden_dim must be a multiple of 8"
    H = D // 2
    L = num_layers
    lay = _slab_layout(D, L)
    slab = jnp.zeros((lay["rows"], LANE), jnp.float32)

    def set_row(s, r, v, width, fill=0.0):
        row = jnp.full((LANE,), fill, jnp.float32).at[:width].set(
            v.reshape(width).astype(jnp.float32))
        return s.at[r, :].set(row)

    def set_block(s, r0, m):
        rows, cols = m.shape
        return s.at[r0:r0 + rows, :cols].set(m.astype(jnp.float32))

    w1s = p["w1"] * p["s1"]                   # column scale commutes with A-matmul
    b1s = p["b1"] * p["s1"]

    slab = set_row(slab, 0, b1s, D)
    slab = set_row(slab, 1, p["t1"], D)
    slab = set_row(slab, 2, p["bg"], D)
    slab = set_row(slab, 3, p["s2"], D)
    slab = set_row(slab, 4, p["t2"], D)
    slab = set_row(slab, 5, p["bm1"], H)
    slab = set_row(slab, 6, p["bm2"], out_dim, fill=NEG_INF)
    # post-tanh FMA constants: sigmoid lanes (i,o) -> 0.5*t + 0.5, tanh lanes (g) -> t
    a_const = jnp.concatenate([jnp.full((2 * D,), 0.5), jnp.ones((D,))])
    b_const = jnp.concatenate([jnp.full((2 * D,), 0.5), jnp.zeros((D,))])
    slab = set_row(slab, 7, a_const, 3 * D)
    slab = set_row(slab, 8, b_const, 3 * D)
    # per-layer LSTM biases (b_ih + b_hh), gate order [i|o|g], i/o scaled by 0.5
    for l in range(L):
        b = p["blstm"][l, 0]
        row = jnp.concatenate([0.5 * b[0:D], 0.5 * b[3 * D:4 * D], b[2 * D:3 * D]])
        slab = set_row(slab, 9 + l, row, 3 * D)

    slab = set_block(slab, lay["w1"], w1s)
    wg_ext = jnp.concatenate(
        [p["wg"],
         p["wg"] @ p["adst"].reshape(D, 1),
         p["wg"] @ p["asrc"].reshape(D, 1)], axis=1)      # (D, D+2)
    slab = set_block(slab, lay["wg"], wg_ext)
    for l in range(L):
        w = p["wih"][l]                                    # (D, 4D), gates i,f,g,o
        w3 = jnp.concatenate(
            [0.5 * w[:, 0:D], 0.5 * w[:, 3 * D:4 * D], w[:, 2 * D:3 * D]], axis=1)
        slab = set_block(slab, lay["wih"] + l * D, w3)
    slab = set_block(slab, lay["wm1"], p["wm1"])
    slab = set_block(slab, lay["wm2"], p["wm2"])
    return slab


def init_params(key, D, out_dim, num_layers=4):
    ks = jax.random.split(key, 16)
    s = 0.2
    eps = 1e-5
    p = {}
    # GraphDiffusionConv.lin : Linear(D, D) (weights pre-transposed to (in,out))
    p["w1"] = s * jax.random.normal(ks[0], (D, D), jnp.float32)
    p["b1"] = s * jax.random.normal(ks[1], (1, D), jnp.float32)
    # bn1 (eval): y = (x - rm)/sqrt(rv+eps)*gamma + beta, rm=0, rv=1 (defaults)
    g1 = 1.0 + 0.1 * jax.random.normal(ks[2], (1, D), jnp.float32)
    b1 = 0.1 * jax.random.normal(ks[3], (1, D), jnp.float32)
    p["s1"] = g1 / jnp.sqrt(1.0 + eps)
    p["t1"] = b1
    # GATConv(D, D), heads=1
    p["wg"] = s * jax.random.normal(ks[4], (D, D), jnp.float32)
    p["asrc"] = s * jax.random.normal(ks[5], (1, D), jnp.float32)
    p["adst"] = s * jax.random.normal(ks[6], (1, D), jnp.float32)
    p["bg"] = s * jax.random.normal(ks[7], (1, D), jnp.float32)
    # bn2
    g2 = 1.0 + 0.1 * jax.random.normal(ks[8], (1, D), jnp.float32)
    b2 = 0.1 * jax.random.normal(ks[9], (1, D), jnp.float32)
    p["s2"] = g2 / jnp.sqrt(1.0 + eps)
    p["t2"] = b2
    # LSTM: W_ih per layer (transposed to (D, 4D), PyTorch gate order i,f,g,o),
    # bias = b_ih + b_hh.  W_hh is irrelevant for seq_len=1 with h0=0.
    p["wih"] = s * jax.random.normal(ks[10], (num_layers, D, 4 * D), jnp.float32)
    p["blstm"] = s * jax.random.normal(ks[11], (num_layers, 1, 4 * D), jnp.float32)
    # MLP head: Linear(D, D//2) -> ReLU -> Linear(D//2, out_dim)
    p["wm1"] = s * jax.random.normal(ks[12], (D, D // 2), jnp.float32)
    p["bm1"] = s * jax.random.normal(ks[13], (1, D // 2), jnp.float32)
    p["wm2"] = s * jax.random.normal(ks[14], (D // 2, out_dim), jnp.float32)
    p["bm2"] = s * jax.random.normal(ks[15], (1, out_dim), jnp.float32)
    return p


if __name__ == "__main__":
    key = jax.random.PRNGKey(0)
    N, D, OUT, L = 16, 32, 8, 4        # num_nodes, input_dim, output_dim, layers
    kx, kp = jax.random.split(key, 2)

    x = jax.random.normal(kx, (N, D), jnp.float32)

    # deterministic graph: bidirectional ring + a few extra directed edges
    idx = jnp.arange(N, dtype=jnp.int32)
    src = jnp.concatenate([idx, (idx + 1) % N, idx[:4]])
    dst = jnp.concatenate([(idx + 1) % N, idx, (idx[:4] + 5) % N])
    edge_index = jnp.stack([src, dst]).astype(jnp.int32)   # (2, 36)

    params = init_params(kp, D, OUT, num_layers=L)
    slab = pack_params(params, D, OUT, num_layers=L)        # once, off hot path

    out = lstm_gdc_forward(x, edge_index, slab, out_dim=OUT, num_layers=L)
    out = jax.block_until_ready(out)

    assert out.shape == (N, OUT)
    assert bool(jnp.all(jnp.isfinite(out)))
    # rows of exp(log_softmax) must sum to 1
    assert bool(jnp.allclose(jnp.sum(jnp.exp(out), axis=1), 1.0, atol=1e-4))
    print("KERNEL_OK")
</pallas_src>

<mosaic_0001>
module attributes {stable_mosaic.version = 11 : i64} {
  func.func @lstm_gdc_kernel(%arg0: memref<16x32xf32, #tpu.memory_space<vmem>>, %arg1: memref<16x16xf32, #tpu.memory_space<vmem>>, %arg2: memref<368x128xf32, #tpu.memory_space<vmem>>, %arg3: memref<16x128xf32, #tpu.memory_space<vmem>>) attributes {dimension_semantics = [], scalar_prefetch = 0 : i64, scratch_operands = 0 : i64, tpu.core_type = #tpu.core_type<tc>} {
    %c0 = arith.constant 0 : index
    %c0_0 = arith.constant 0 : index
    %0 = vector.load %arg0[%c0, %c0_0] : memref<16x32xf32, #tpu.memory_space<vmem>>, vector<16x32xf32>
    %c0_1 = arith.constant 0 : index
    %c0_2 = arith.constant 0 : index
    %1 = vector.load %arg1[%c0_1, %c0_2] : memref<16x16xf32, #tpu.memory_space<vmem>>, vector<16x16xf32>
    %c0_3 = arith.constant 0 : index
    %c0_4 = arith.constant 0 : index
    %2 = vector.load %arg2[%c0_3, %c0_4] : memref<368x128xf32, #tpu.memory_space<vmem>>, vector<16x128xf32>
    %3 = vector.extract_strided_slice %2 {offsets = [0, 0], sizes = [1, 32], strides = [1, 1]} : vector<16x128xf32> to vector<1x32xf32>
    %4 = vector.extract_strided_slice %2 {offsets = [1, 0], sizes = [1, 32], strides = [1, 1]} : vector<16x128xf32> to vector<1x32xf32>
    %5 = vector.extract_strided_slice %2 {offsets = [2, 0], sizes = [1, 32], strides = [1, 1]} : vector<16x128xf32> to vector<1x32xf32>
    %6 = vector.extract_strided_slice %2 {offsets = [3, 0], sizes = [1, 32], strides = [1, 1]} : vector<16x128xf32> to vector<1x32xf32>
    %7 = vector.extract_strided_slice %2 {offsets = [4, 0], sizes = [1, 32], strides = [1, 1]} : vector<16x128xf32> to vector<1x32xf32>
    %8 = vector.extract_strided_slice %2 {offsets = [5, 0], sizes = [1, 128], strides = [1, 1]} : vector<16x128xf32> to vector<1x128xf32>
    %9 = vector.extract_strided_slice %2 {offsets = [6, 0], sizes = [1, 128], strides = [1, 1]} : vector<16x128xf32> to vector<1x128xf32>
    %10 = vector.extract_strided_slice %2 {offsets = [7, 0], sizes = [1, 128], strides = [1, 1]} : vector<16x128xf32> to vector<1x128xf32>
    %11 = vector.extract_strided_slice %2 {offsets = [8, 0], sizes = [1, 128], strides = [1, 1]} : vector<16x128xf32> to vector<1x128xf32>
    %c16 = arith.constant 16 : index
    %c0_5 = arith.constant 0 : index
    %12 = vector.load %arg2[%c16, %c0_5] : memref<368x128xf32, #tpu.memory_space<vmem>>, vector<32x128xf32>
    %13 = vector.extract_strided_slice %12 {offsets = [0, 0], sizes = [32, 32], strides = [1, 1]} : vector<32x128xf32> to vector<32x32xf32>
    %c48 = arith.constant 48 : index
    %c0_6 = arith.constant 0 : index
    %14 = vector.load %arg2[%c48, %c0_6] : memref<368x128xf32, #tpu.memory_space<vmem>>, vector<32x128xf32>
    %c208 = arith.constant 208 : index
    %c0_7 = arith.constant 0 : index
    %15 = vector.load %arg2[%c208, %c0_7] : memref<368x128xf32, #tpu.memory_space<vmem>>, vector<32x128xf32>
    %c240 = arith.constant 240 : index
    %c0_8 = arith.constant 0 : index
    %16 = vector.load %arg2[%c240, %c0_8] : memref<368x128xf32, #tpu.memory_space<vmem>>, vector<128x128xf32>
    %cst = arith.constant dense<0.000000e+00> : vector<16xf32>
    %17 = vector.multi_reduction <add>, %1, %cst [0] : vector<16x16xf32> to vector<16xf32>
    %18 = vector.shape_cast %17 : vector<16xf32> to vector<1x16xf32>
    %cst_9 = arith.constant 0.000000e+00 : f32
    %19 = vector.broadcast %cst_9 : f32 to vector<1x16xf32>
    %20 = arith.cmpf ogt, %18, %19 : vector<1x16xf32>
    %21 = math.rsqrt %18 : vector<1x16xf32>
    %cst_10 = arith.constant 0.000000e+00 : f32
    %22 = vector.broadcast %cst_10 : f32 to vector<1x16xf32>
    %23 = arith.select %20, %21, %22 : vector<1x16xi1>, vector<1x16xf32>
    %24 = vector.broadcast %23 : vector<1x16xf32> to vector<16x16xf32>
    %25 = arith.mulf %1, %24 : vector<16x16xf32>
    %26 = tpu.transpose %23, [1, 0] : vector<1x16xf32> -> vector<16x1xf32>
    %27 = vector.broadcast %26 : vector<16x1xf32> to vector<16x16xf32>
    %28 = arith.mulf %25, %27 : vector<16x16xf32>
    %cst_11 = arith.constant dense<0.000000e+00> : vector<16x32xf32>
    %29 = tpu.matmul %0, %13, %cst_11 {dimension_numbers = #tpu.dot_dimension_numbers<[1], [0], [0], [1], [0, 0, 1, 1], [], []>} : vector<16x32xf32>, vector<32x32xf32>, vector<16x32xf32> -> vector<16x32xf32>
    %30 = vector.broadcast %3 : vector<1x32xf32> to vector<16x32xf32>
    %31 = arith.addf %29, %30 : vector<16x32xf32>
    %cst_12 = arith.constant dense<0.000000e+00> : vector<16x32xf32>
    %32 = tpu.matmul %28, %31, %cst_12 {dimension_numbers = #tpu.dot_dimension_numbers<[1], [0], [0], [1], [0, 0, 1, 1], [], []>} : vector<16x16xf32>, vector<16x32xf32>, vector<16x32xf32> -> vector<16x32xf32>
    %33 = vector.broadcast %4 : vector<1x32xf32> to vector<16x32xf32>
    %34 = arith.addf %32, %33 : vector<16x32xf32>
    %cst_13 = arith.constant 0.000000e+00 : f32
    %35 = vector.broadcast %cst_13 : f32 to vector<16x32xf32>
    %36 = arith.maximumf %34, %35 : vector<16x32xf32>
    %cst_14 = arith.constant dense<0.000000e+00> : vector<16x128xf32>
    %37 = tpu.matmul %36, %14, %cst_14 {dimension_numbers = #tpu.dot_dimension_numbers<[1], [0], [0], [1], [0, 0, 1, 1], [], []>} : vector<16x32xf32>, vector<32x128xf32>, vector<16x128xf32> -> vector<16x128xf32>
    %38 = vector.extract_strided_slice %37 {offsets = [0, 0], sizes = [16, 32], strides = [1, 1]} : vector<16x128xf32> to vector<16x32xf32>
    %39 = vector.extract_strided_slice %37 {offsets = [0, 32], sizes = [16, 1], strides = [1, 1]} : vector<16x128xf32> to vector<16x1xf32>
    %40 = vector.extract_strided_slice %37 {offsets = [0, 33], sizes = [16, 1], strides = [1, 1]} : vector<16x128xf32> to vector<16x1xf32>
    %41 = tpu.transpose %40, [1, 0] : vector<16x1xf32> -> vector<1x16xf32>
    %42 = vector.broadcast %39 : vector<16x1xf32> to vector<16x16xf32>
    %43 = vector.broadcast %41 : vector<1x16xf32> to vector<16x16xf32>
    %44 = arith.addf %42, %43 : vector<16x16xf32>
    %cst_15 = arith.constant 0.000000e+00 : f32
    %45 = vector.broadcast %cst_15 : f32 to vector<16x16xf32>
    %46 = arith.cmpf ogt, %44, %45 : vector<16x16xf32>
    %cst_16 = arith.constant 2.000000e-01 : f32
    %47 = vector.broadcast %cst_16 : f32 to vector<16x16xf32>
    %48 = arith.mulf %47, %44 : vector<16x16xf32>
    %49 = arith.select %46, %44, %48 : vector<16x16xi1>, vector<16x16xf32>
    %cst_17 = arith.constant 0.000000e+00 : f32
    %50 = vector.broadcast %cst_17 : f32 to vector<16x16xf32>
    %51 = arith.cmpf ogt, %1, %50 : vector<16x16xf32>
    %cst_18 = arith.constant -1.000000e+30 : f32
    %52 = vector.broadcast %cst_18 : f32 to vector<16x16xf32>
    %53 = arith.select %51, %49, %52 : vector<16x16xi1>, vector<16x16xf32>
    %cst_19 = arith.constant dense<0xFF800000> : vector<16xf32>
    %54 = vector.multi_reduction <maximumf>, %53, %cst_19 [1] : vector<16x16xf32> to vector<16xf32>
    %55 = vector.shape_cast %54 : vector<16xf32> to vector<16x1xf32>
    %56 = vector.broadcast %55 : vector<16x1xf32> to vector<16x16xf32>
    %57 = arith.subf %53, %56 : vector<16x16xf32>
    %58 = math.exp %57 : vector<16x16xf32>
    %cst_20 = arith.constant dense<0.000000e+00> : vector<16xf32>
    %59 = vector.multi_reduction <add>, %58, %cst_20 [1] : vector<16x16xf32> to vector<16xf32>
    %60 = vector.shape_cast %59 : vector<16xf32> to vector<16x1xf32>
    %cst_21 = arith.constant dense<0.000000e+00> : vector<16x32xf32>
    %61 = tpu.matmul %58, %38, %cst_21 {dimension_numbers = #tpu.dot_dimension_numbers<[1], [0], [0], [1], [0, 0, 1, 1], [], []>} : vector<16x16xf32>, vector<16x32xf32>, vector<16x32xf32> -> vector<16x32xf32>
    %62 = tpu.reciprocal %60 {approx = true} : vector<16x1xf32> -> vector<16x1xf32>
    %63 = vector.broadcast %62 : vector<16x1xf32> to vector<16x32xf32>
    %64 = arith.mulf %61, %63 : vector<16x32xf32>
    %65 = vector.broadcast %5 : vector<1x32xf32> to vector<16x32xf32>
    %66 = arith.addf %64, %65 : vector<16x32xf32>
    %67 = vector.broadcast %6 : vector<1x32xf32> to vector<16x32xf32>
    %68 = arith.mulf %66, %67 : vector<16x32xf32>
    %69 = vector.broadcast %7 : vector<1x32xf32> to vector<16x32xf32>
    %70 = arith.addf %68, %69 : vector<16x32xf32>
    %cst_22 = arith.constant 0.000000e+00 : f32
    %71 = vector.broadcast %cst_22 : f32 to vector<16x32xf32>
    %72 = arith.maximumf %70, %71 : vector<16x32xf32>
    %c80 = arith.constant 80 : index
    %c0_23 = arith.constant 0 : index
    %73 = vector.load %arg2[%c80, %c0_23] : memref<368x128xf32, #tpu.memory_space<vmem>>, vector<32x128xf32>
    %cst_24 = arith.constant dense<0.000000e+00> : vector<16x128xf32>
    %74 = tpu.matmul %72, %73, %cst_24 {dimension_numbers = #tpu.dot_dimension_numbers<[1], [0], [0], [1], [0, 0, 1, 1], [], []>} : vector<16x32xf32>, vector<32x128xf32>, vector<16x128xf32> -> vector<16x128xf32>
    %75 = vector.extract_strided_slice %2 {offsets = [9, 0], sizes = [1, 128], strides = [1, 1]} : vector<16x128xf32> to vector<1x128xf32>
    %76 = vector.broadcast %75 : vector<1x128xf32> to vector<16x128xf32>
    %77 = arith.addf %74, %76 : vector<16x128xf32>
    %78 = math.tanh %77 : vector<16x128xf32>
    %79 = vector.broadcast %10 : vector<1x128xf32> to vector<16x128xf32>
    %80 = arith.mulf %79, %78 : vector<16x128xf32>
    %81 = vector.broadcast %11 : vector<1x128xf32> to vector<16x128xf32>
    %82 = arith.addf %80, %81 : vector<16x128xf32>
    %83 = vector.extract_strided_slice %82 {offsets = [0, 0], sizes = [16, 32], strides = [1, 1]} : vector<16x128xf32> to vector<16x32xf32>
    %84 = vector.extract_strided_slice %82 {offsets = [0, 32], sizes = [16, 32], strides = [1, 1]} : vector<16x128xf32> to vector<16x32xf32>
    %85 = vector.extract_strided_slice %82 {offsets = [0, 64], sizes = [16, 32], strides = [1, 1]} : vector<16x128xf32> to vector<16x32xf32>
    %86 = arith.mulf %83, %85 : vector<16x32xf32>
    %87 = math.tanh %86 : vector<16x32xf32>
    %88 = arith.mulf %84, %87 : vector<16x32xf32>
    %c112 = arith.constant 112 : index
    %c0_25 = arith.constant 0 : index
    %89 = vector.load %arg2[%c112, %c0_25] : memref<368x128xf32, #tpu.memory_space<vmem>>, vector<32x128xf32>
    %cst_26 = arith.constant dense<0.000000e+00> : vector<16x128xf32>
    %90 = tpu.matmul %88, %89, %cst_26 {dimension_numbers = #tpu.dot_dimension_numbers<[1], [0], [0], [1], [0, 0, 1, 1], [], []>} : vector<16x32xf32>, vector<32x128xf32>, vector<16x128xf32> -> vector<16x128xf32>
    %91 = vector.extract_strided_slice %2 {offsets = [10, 0], sizes = [1, 128], strides = [1, 1]} : vector<16x128xf32> to vector<1x128xf32>
    %92 = vector.broadcast %91 : vector<1x128xf32> to vector<16x128xf32>
    %93 = arith.addf %90, %92 : vector<16x128xf32>
    %94 = math.tanh %93 : vector<16x128xf32>
    %95 = vector.broadcast %10 : vector<1x128xf32> to vector<16x128xf32>
    %96 = arith.mulf %95, %94 : vector<16x128xf32>
    %97 = vector.broadcast %11 : vector<1x128xf32> to vector<16x128xf32>
    %98 = arith.addf %96, %97 : vector<16x128xf32>
    %99 = vector.extract_strided_slice %98 {offsets = [0, 0], sizes = [16, 32], strides = [1, 1]} : vector<16x128xf32> to vector<16x32xf32>
    %100 = vector.extract_strided_slice %98 {offsets = [0, 32], sizes = [16, 32], strides = [1, 1]} : vector<16x128xf32> to vector<16x32xf32>
    %101 = vector.extract_strided_slice %98 {offsets = [0, 64], sizes = [16, 32], strides = [1, 1]} : vector<16x128xf32> to vector<16x32xf32>
    %102 = arith.mulf %99, %101 : vector<16x32xf32>
    %103 = math.tanh %102 : vector<16x32xf32>
    %104 = arith.mulf %100, %103 : vector<16x32xf32>
    %c144 = arith.constant 144 : index
    %c0_27 = arith.constant 0 : index
    %105 = vector.load %arg2[%c144, %c0_27] : memref<368x128xf32, #tpu.memory_space<vmem>>, vector<32x128xf32>
    %cst_28 = arith.constant dense<0.000000e+00> : vector<16x128xf32>
    %106 = tpu.matmul %104, %105, %cst_28 {dimension_numbers = #tpu.dot_dimension_numbers<[1], [0], [0], [1], [0, 0, 1, 1], [], []>} : vector<16x32xf32>, vector<32x128xf32>, vector<16x128xf32> -> vector<16x128xf32>
    %107 = vector.extract_strided_slice %2 {offsets = [11, 0], sizes = [1, 128], strides = [1, 1]} : vector<16x128xf32> to vector<1x128xf32>
    %108 = vector.broadcast %107 : vector<1x128xf32> to vector<16x128xf32>
    %109 = arith.addf %106, %108 : vector<16x128xf32>
    %110 = math.tanh %109 : vector<16x128xf32>
    %111 = vector.broadcast %10 : vector<1x128xf32> to vector<16x128xf32>
    %112 = arith.mulf %111, %110 : vector<16x128xf32>
    %113 = vector.broadcast %11 : vector<1x128xf32> to vector<16x128xf32>
    %114 = arith.addf %112, %113 : vector<16x128xf32>
    %115 = vector.extract_strided_slice %114 {offsets = [0, 0], sizes = [16, 32], strides = [1, 1]} : vector<16x128xf32> to vector<16x32xf32>
    %116 = vector.extract_strided_slice %114 {offsets = [0, 32], sizes = [16, 32], strides = [1, 1]} : vector<16x128xf32> to vector<16x32xf32>
    %117 = vector.extract_strided_slice %114 {offsets = [0, 64], sizes = [16, 32], strides = [1, 1]} : vector<16x128xf32> to vector<16x32xf32>
    %118 = arith.mulf %115, %117 : vector<16x32xf32>
    %119 = math.tanh %118 : vector<16x32xf32>
    %120 = arith.mulf %116, %119 : vector<16x32xf32>
    %c176 = arith.constant 176 : index
    %c0_29 = arith.constant 0 : index
    %121 = vector.load %arg2[%c176, %c0_29] : memref<368x128xf32, #tpu.memory_space<vmem>>, vector<32x128xf32>
    %cst_30 = arith.constant dense<0.000000e+00> : vector<16x128xf32>
    %122 = tpu.matmul %120, %121, %cst_30 {dimension_numbers = #tpu.dot_dimension_numbers<[1], [0], [0], [1], [0, 0, 1, 1], [], []>} : vector<16x32xf32>, vector<32x128xf32>, vector<16x128xf32> -> vector<16x128xf32>
    %123 = vector.extract_strided_slice %2 {offsets = [12, 0], sizes = [1, 128], strides = [1, 1]} : vector<16x128xf32> to vector<1x128xf32>
    %124 = vector.broadcast %123 : vector<1x128xf32> to vector<16x128xf32>
    %125 = arith.addf %122, %124 : vector<16x128xf32>
    %126 = math.tanh %125 : vector<16x128xf32>
    %127 = vector.broadcast %10 : vector<1x128xf32> to vector<16x128xf32>
    %128 = arith.mulf %127, %126 : vector<16x128xf32>
    %129 = vector.broadcast %11 : vector<1x128xf32> to vector<16x128xf32>
    %130 = arith.addf %128, %129 : vector<16x128xf32>
    %131 = vector.extract_strided_slice %130 {offsets = [0, 0], sizes = [16, 32], strides = [1, 1]} : vector<16x128xf32> to vector<16x32xf32>
    %132 = vector.extract_strided_slice %130 {offsets = [0, 32], sizes = [16, 32], strides = [1, 1]} : vector<16x128xf32> to vector<16x32xf32>
    %133 = vector.extract_strided_slice %130 {offsets = [0, 64], sizes = [16, 32], strides = [1, 1]} : vector<16x128xf32> to vector<16x32xf32>
    %134 = arith.mulf %131, %133 : vector<16x32xf32>
    %135 = math.tanh %134 : vector<16x32xf32>
    %136 = arith.mulf %132, %135 : vector<16x32xf32>
    %cst_31 = arith.constant dense<0.000000e+00> : vector<16x128xf32>
    %137 = tpu.matmul %136, %15, %cst_31 {dimension_numbers = #tpu.dot_dimension_numbers<[1], [0], [0], [1], [0, 0, 1, 1], [], []>} : vector<16x32xf32>, vector<32x128xf32>, vector<16x128xf32> -> vector<16x128xf32>
    %138 = vector.broadcast %8 : vector<1x128xf32> to vector<16x128xf32>
    %139 = arith.addf %137, %138 : vector<16x128xf32>
    %cst_32 = arith.constant 0.000000e+00 : f32
    %140 = vector.broadcast %cst_32 : f32 to vector<16x128xf32>
    %141 = arith.maximumf %139, %140 : vector<16x128xf32>
    %cst_33 = arith.constant dense<0.000000e+00> : vector<16x128xf32>
    %142 = tpu.matmul %141, %16, %cst_33 {dimension_numbers = #tpu.dot_dimension_numbers<[1], [0], [0], [1], [0, 0, 1, 1], [], []>} : vector<16x128xf32>, vector<128x128xf32>, vector<16x128xf32> -> vector<16x128xf32>
    %143 = vector.broadcast %9 : vector<1x128xf32> to vector<16x128xf32>
    %144 = arith.addf %142, %143 : vector<16x128xf32>
    %cst_34 = arith.constant dense<0xFF800000> : vector<16xf32>
    %145 = vector.multi_reduction <maximumf>, %144, %cst_34 [1] : vector<16x128xf32> to vector<16xf32>
    %146 = vector.shape_cast %145 : vector<16xf32> to vector<16x1xf32>
    %147 = vector.broadcast %146 : vector<16x1xf32> to vector<16x128xf32>
    %148 = arith.subf %144, %147 : vector<16x128xf32>
    %149 = math.exp %148 : vector<16x128xf32>
    %cst_35 = arith.constant dense<0.000000e+00> : vector<16xf32>
    %150 = vector.multi_reduction <add>, %149, %cst_35 [1] : vector<16x128xf32> to vector<16xf32>
    %151 = vector.shape_cast %150 : vector<16xf32> to vector<16x1xf32>
    %152 = math.log %151 : vector<16x1xf32>
    %153 = vector.broadcast %152 : vector<16x1xf32> to vector<16x128xf32>
    %154 = arith.subf %148, %153 : vector<16x128xf32>
    %c0_36 = arith.constant 0 : index
    %c0_37 = arith.constant 0 : index
    %155 = vector.load %arg3[%c0_36, %c0_37] : memref<16x128xf32, #tpu.memory_space<vmem>>, vector<16x128xf32>
    tpu.vector_store %arg3[%c0_36, %c0_37], %154 {strides = array<i32>} : memref<16x128xf32, #tpu.memory_space<vmem>>, vector<16x128xf32>,
    return
  }
}

</mosaic_0001>

<bundles_post_ra>
// kernel: lstm_gdc_forward.1
= control target key start
LH: loop header
LB: loop body
LE: loop exit
PB: predicated region body
PF: predicated region fallthrough
CT: control target
= control target key end

     0   :  { %vm48_vm0 = vcmask 130048   ;;  %vm111_vm1 = vcmask 261120   ;;  %v1601_v3 = vmov 0   ;;  %v107_v24 = vlaneseq  ;;  %s1603_s9 = smov 95   ;;  %s1604_s20 = smov 64   ;;  %s1909_s1 = inlined_call_operand.vmem [shape: f32[16,16], index: 1, kind: input, shape index: {}]   ;;  %s1910_s2 = inlined_call_operand.vmem [shape: f32[368,128], index: 2, kind: input, shape index: {}]   ;;  %s1911_s0 = inlined_call_operand.vmem [shape: f32[16,32], index: 0, kind: input, shape index: {}]   ;;  %s1912_s3 = inlined_call_operand.vmem [shape: f32[16,128], index: 3, kind: output, shape index: {}]  }
   0x1   :  { %v1630_v0 = vld [vmem:[%s1909_s1] sm:$0xff]  ;;  %v1635_v1 = vld [vmem:[%s1909_s1 + $0x8] sm:$0xff]  ;;  %v20_v2 = vld [vmem:[%s1910_s2 + $0x10] sm:$0xff]  ;;  %1548 = vset.pattern.permute.xlu1 %v1601_v3  ;;  %v1602_v54 = vmov 32   ;;  %s1605_s24 = smov 32   ;;  %s1606_s28 = smov 96  }
   0x2   :  { %v49_v4 = vsel %vm48_vm0, %v1630_v0, 0.0  ;;  %v50_v5 = vsel %vm48_vm0, %v1635_v1, 0.0  ;;  %v21_v6 = vld [vmem:[%s1910_s2 + $0x18] sm:$0xff]  ;;  %v22_v7 = vld [vmem:[%s1910_s2 + $0x20] sm:$0xff]  ;;  %v23_v8 = vld [vmem:[%s1910_s2 + $0x28] sm:$0xff]  ;;  %v1661_v25 = vshrl.u32 %v107_v24, 7 }
   0x3   :  { %v51_v9 = vadd.f32 %v50_v5, %v49_v4  ;;  %v1444_v10 = vpack.c.bf16 %v21_v6, %v20_v2  ;;  %v1448_v11 = vpack.c.bf16 %v23_v8, %v22_v7  ;;  %v14_v12 = vld [vmem:[%s1911_s0] sm:$0xff]  ;;  %v15_v16 = vld [vmem:[%s1911_s0 + $0x8] sm:$0xff]  ;;  %v24_v32 = vld [vmem:[%s1910_s2 + $0x30] sm:$0xff]  ;;  %vm422_vm3 = vcmp.gt.f32.partialorder %v1635_v1, 0.0 }
   0x4   :  { %1326 = vmatprep.mubr.msk.f32.mxu0 %vm111_vm1, %v14_v12  ;;  %v1664_v26 = vsub.s32 0, %v1661_v25  ;;  %v1669_v27 = vld [vmem:[%s1910_s2] sm:$0xff]  ;;  %v25_v33 = vld [vmem:[%s1910_s2 + $0x38] sm:$0xff]  ;;  %v27_v44 = vld [vmem:[%s1910_s2 + $0x48] sm:$0xff]  ;;  %v195_v46 = vsub.s32 1, %v1661_v25  ;;  %vm421_vm4 = vcmp.gt.f32.partialorder %v1630_v0, 0.0 }
   0x5   :  { %v52_v13 = vrot.slane %v51_v9, 4  ;;  %1445 = vmatprep.subr.bf16.mxu0 %v1444_v10  ;;  %v1456_v36 = vpack.c.bf16 %v25_v33, %v24_v32  ;;  %v26_v43 = vld [vmem:[%s1910_s2 + $0x40] sm:$0xff]  ;;  %v551_v24 = vld [vmem:[%s1910_s2 + $0x68] sm:$0xff]  ;;  %v536_v32 = vsub.s32 3, %v1661_v25 }
   0x6   :  { %1447 = vmatpush3.bf16.msra.mxu0 %v1444_v10  ;;  %v110_v28 = vrot.slane %v1669_v27, %v1664_v26  ;;  %v1460_v45 = vpack.c.bf16 %v27_v44, %v26_v43  ;;  %v196_v47 = vrot.slane %v1669_v27, %v195_v46 }
   0x7   :  { %v53_v14 = vadd.f32 %v52_v13, %v51_v9  ;;  %1449 = vmatprep.subr.bf16.mxu0 %v1448_v11 }
   0x9   :  { %v54_v15 = vrot.slane %v53_v14, 2 }
   0xa   :  { %1451 = vmatpush3.bf16.msra.mxu0 %v1448_v11 }
   0xb   :  { %v55_v17 = vadd.f32 %v54_v15, %v53_v14 }
   0xd   :  { %v56_v18 = vrot.slane %v55_v17, 1  ;;  %1327 = vmatmul.mubr.msk.f32.vlgmr.msra.gmra.mrb[0].mxu0 %vm111_vm1, %v15_v16 }
   0xf   :  { %v57_v19 = vadd.f32 %v56_v18, %v55_v17 }
  0x11   :  { %1551 = vrsqrt.f32 %v57_v19  ;;  %vm58_vm2 = vcmp.gt.f32.partialorder %v57_v19, 0.0 }
  0x1b   :  { %v1552_v20 = vpop.eup %1551 }
  0x1c   :  { %v60_v21 = vsel %vm58_vm2, %v1552_v20, 0.0  ;;  %v548_v20 = vld [vmem:[%s1910_s2 + $0x50] sm:$0xff] }
  0x1d   :  { %63 = vxpose.xlu0.b32.start.end [1/1] (short) (narrow) %v60_v21, 16  ;;  %v61_v37 = vmul.f32 %v60_v21, %v1630_v0  ;;  %v62_v40 = vmul.f32 %v60_v21, %v1635_v1  ;;  %v549_v21 = vld [vmem:[%s1910_s2 + $0x58] sm:$0xff] }
  0x46   :  { %1547 = vset.pattern.permute.xlu0 %v1601_v3 }
  0x9d   :  { %v79_v22 = vpop.trf.xlu0 }
  0x9e   :  { %97 = vperm.xlu0 %1547, %v79_v22   ;;  %v1468_v22 = vpack.c.bf16 %v549_v21, %v548_v20 }
  0xa1   :  { %v80_v23 = vpop.trf.xlu0 }
  0xa2   :  { %102 = vperm.xlu1 %1548, %v80_v23   ;;  %1550 = vset.pattern.permute.xlu0 %v1602_v54  ;;  %v550_v23 = vld [vmem:[%s1910_s2 + $0x60] sm:$0xff] }
  0xa6   :  { %1549 = vset.pattern.permute.xlu1 %v1602_v54 }
  0xe0   :  { %v1328_v29 = vpop.f32.mrb[0].mxu0 }
  0xe1   :  { %v190_v30 = vadd.f32 %v1328_v29, %v110_v28  ;;  %v184_v31 = vpop.f32.mrb[1].mxu0 }
  0xe2   :  { %v185_v34 = vadd.f32 %v184_v31, %v110_v28  ;;  %v1472_v28 = vpack.c.bf16 %v551_v24, %v550_v23  ;;  %v530_v31 = vsub.s32 2, %v1661_v25 }
  0xe4   :  { %v1452_v35 = vpack.c.bf16 %v190_v30, %v185_v34  ;;  %v531_v33 = vrot.slane %v1669_v27, %v530_v31  ;;  %v542_v34 = vsub.s32 4, %v1661_v25 }
  0xe6   :  { %1453 = vmatprep.subr.bf16.mxu0 %v1452_v35  ;;  %v543_v43 = vrot.slane %v1669_v27, %v542_v34 }
  0xe7   :  { %1455 = vmatpush3.bf16.msra.mxu0 %v1452_v35 }
  0xe8   :  { %1457 = vmatprep.subr.bf16.mxu0 %v1456_v36 }
 0x11d   :  { %v98_v38 = vpop.permute.xlu0 %97 }
 0x11e   :  { %v105_v39 = vmul.f32 %v98_v38, %v61_v37 }
 0x120   :  { %1333 = vmatprep.mubr.msk.f32.mxu0 %vm48_vm0, %v105_v39  ;;  %v537_v39 = vrot.slane %v1669_v27, %v536_v32 }
 0x121   :  { %v103_v41 = vpop.permute.xlu1 %102 }
 0x122   :  { %v106_v42 = vmul.f32 %v103_v41, %v62_v40 }
 0x124   :  { %1334 = vmatmul.mubr.msk.f32.vlgmr.msra.gmra.mrb[2].mxu0 %vm48_vm0, %v106_v42 }
 0x125   :  { %1459 = vmatpush3.bf16.msra.mxu0 %v1456_v36 }
 0x126   :  { %1461 = vmatprep.subr.bf16.mxu0 %v1460_v45 }
 0x129   :  { %1463 = vmatpush3.bf16.msra.mxu0 %v1460_v45 }
 0x1f7   :  { %v1335_v48 = vpop.f32.mrb[2].mxu0 }
 0x1f8   :  { %v275_v49 = vadd.f32 %v1335_v48, %v196_v47  ;;  %v269_v50 = vpop.f32.mrb[3].mxu0 }
 0x1f9   :  { %v270_v51 = vadd.f32 %v269_v50, %v196_v47 }
 0x1fa   :  { %v279_v53 = vmax.f32 %v275_v49, 0.0 }
 0x1fb   :  { %v278_v52 = vmax.f32 %v270_v51, 0.0 }
 0x1fd   :  { %1344 = vmatprep.mubr.msk.f32.mxu0 %vm111_vm1, %v278_v52  ;;  %v1733_v52 = vld [vmem:[%s1910_s2 + $0x8] sm:$0xff] }
 0x1fe   :  { %1345 = vmatmul.mubr.msk.f32.vlgmr.msra.gmra.mrb[4].mxu0 %vm111_vm1, %v279_v53  ;;  %v555_v53 = vrot.slane %v1733_v52, %v195_v46 }
 0x2d1   :  { %v1346_v55 = vpop.f32.mrb[4].mxu0 }
 0x2d2   :  { %v352_v56 = vpop.f32.mrb[5].mxu0 }
 0x2d3   :  { %v1464_v57 = vpack.c.bf16 %v1346_v55, %v352_v56  ;;  %363 = vrot.lane.b32.xlu1 %v352_v56, %s1603_s9 }
 0x2d5   :  { %1465 = vmatprep.subr.bf16.mxu0 %v1464_v57 }
 0x2d6   :  { %1467 = vmatpush3.bf16.msra.mxu0 %v1464_v57 }
 0x2d7   :  { %365 = vrot.lane.b32.xlu1 %v1346_v55, %s1603_s9  ;;  %1469 = vmatprep.subr.bf16.mxu0 %v1468_v22 }
 0x2db   :  { %406 = vperm.xlu1 %1549, %v1346_v55  }
 0x2df   :  { %402 = vperm.xlu1 %1549, %v352_v56  }
 0x345   :  { %v364_v58 = vpop.permute.xlu1 %363 }
 0x346   :  { %369 = vxpose.xlu1.b32.start [1/2] (short) (narrow) %v364_v58, 8  ;;  %v641_v58 = vsub.s32 7, %v1661_v25 }
 0x349   :  { %v366_v59 = vpop.permute.xlu1 %365 }
 0x34a   :  { %370 = vxpose.xlu1.b32.end [2/2] (short) (narrow) %v366_v59, 8  ;;  %v1740_v59 = vrot.slane %v1669_v27, %v641_v58 }
 0x35a   :  { %v407_v60 = vpop.permute.xlu1 %406 }
 0x35e   :  { %v403_v61 = vpop.permute.xlu1 %402 }
 0x3c6   :  { %v385_v62 = vpop.trf.xlu1 }
 0x3c7   :  { %v412_v63 = vrot.slane %v385_v62, %v1664_v26 }
 0x3c9   :  { %v413_v2 = vadd.f32 %v412_v63, %v403_v61  ;;  %v414_v3 = vadd.f32 %v412_v63, %v407_v60  ;;  %v1744_v60 = vrot.slane %v1733_v52, %v1664_v26 }
 0x3cb   :  { %vm416_vm5 = vcmp.gt.f32.partialorder %v414_v3, 0.0  ;;  %v418_v4 = vmul.f32 0.2, %v414_v3  ;;  %vm415_vm6 = vcmp.gt.f32.partialorder %v413_v2, 0.0  ;;  %v417_v5 = vmul.f32 0.2, %v413_v2 }
 0x3cd   :  { %v420_v6 = vsel %vm416_vm5, %v414_v3, %v418_v4  ;;  %v419_v7 = vsel %vm415_vm6, %v413_v2, %v417_v5 }
 0x3ce   :  { %v424_v8 = vsel %vm422_vm3, %v420_v6, -1e+30  ;;  %v423_v9 = vsel %vm421_vm4, %v419_v7, -1e+30  ;;  %v673_v7 = vld [vmem:[%s1910_s2 + $0x70] sm:$0xff] }
 0x3cf   :  { %v428_v10 = vsel %vm48_vm0, %v424_v8, -inf  ;;  %v425_v11 = vsel %vm48_vm0, %v423_v9, -inf }
 0x3d0   :  { %429 = vmax.xlane.f32.xlu1 %v428_v10  ;;  %426 = vmax.xlane.f32.xlu0 %v425_v11 }
 0x45d   :  { %v430_v12 = vpop.xlane.xlu1 %429  ;;  %v427_v13 = vpop.xlane.xlu0 %426 }
 0x45e   :  { %v432_v14 = vsub.f32 %v424_v8, %v430_v12  ;;  %v431_v1 = vsub.f32 %v423_v9, %v427_v13  ;;  %v674_v8 = vld [vmem:[%s1910_s2 + $0x78] sm:$0xff]  ;;  %v675_v12 = vld [vmem:[%s1910_s2 + $0x80] sm:$0xff]  ;;  %v676_v13 = vld [vmem:[%s1910_s2 + $0x88] sm:$0xff] }
 0x45f   :  { %v1476_v9 = vpack.c.bf16 %v674_v8, %v673_v7  ;;  %v915_v7 = vld [vmem:[%s1910_s2 + $0xb0] sm:$0xff]  ;;  %v916_v8 = vld [vmem:[%s1910_s2 + $0xb8] sm:$0xff] }
 0x460   :  { %v435_v15 = vmul.f32 1.442695, %v432_v14  ;;  %v433_v0 = vmul.f32 1.442695, %v431_v1  ;;  %v1480_v14 = vpack.c.bf16 %v676_v13, %v675_v12 }
 0x461   :  { %1477 = vmatprep.subr.bf16.mxu1 %v1476_v9 }
 0x462   :  { %1553 = vpow2.f32 %v435_v15  ;;  %1479 = vmatpush3.bf16.msra.mxu1 %v1476_v9  ;;  %v917_v9 = vld [vmem:[%s1910_s2 + $0xc0] sm:$0xff] }
 0x463   :  { %1555 = vpow2.f32 %v433_v0  ;;  %1481 = vmatprep.subr.bf16.mxu1 %v1480_v14 }
 0x466   :  { %1483 = vmatpush3.bf16.msra.mxu1 %v1480_v14 }
 0x46c   :  { %v1554_v16 = vpop.eup %1553 }
 0x46d   :  { %v1556_v17 = vpop.eup %1555  ;;  %v440_v19 = vsel %vm48_vm0, %v1554_v16, 0.0 }
 0x46e   :  { %1351 = vmatprep.mubr.msk.f32.mxu0 %vm48_vm0, %v1556_v17  ;;  %v437_v18 = vsel %vm48_vm0, %v1556_v17, 0.0 }
 0x46f   :  { %438 = vadd.xlane.f32.xlu0 %v437_v18  ;;  %1352 = vmatmul.mubr.msk.f32.vlgmr.msra.gmra.mrb[6].mxu0 %vm48_vm0, %v1554_v16 }
 0x470   :  { %1471 = vmatpush3.bf16.msra.mxu0 %v1468_v22 }
 0x471   :  { %1473 = vmatprep.subr.bf16.mxu0 %v1472_v28 }
 0x473   :  { %441 = vadd.xlane.f32.xlu0 %v440_v19  ;;  %v680_v19 = vrot.slane %v1733_v52, %v530_v31 }
 0x474   :  { %1475 = vmatpush3.bf16.msra.mxu0 %v1472_v28 }
 0x4fc   :  { %v439_v29 = vpop.xlane.xlu0 %438 }
 0x500   :  { %v442_v30 = vpop.xlane.xlu0 %441 }
 0x501   :  { %1557 = vrcp.f32 %v442_v30 }
 0x502   :  { %1559 = vrcp.f32 %v439_v29 }
 0x50b   :  { %v1558_v35 = vpop.eup %1557 }
 0x50c   :  { %v1560_v37 = vpop.eup %1559 }
 0x542   :  { %v1353_v36 = vpop.f32.mrb[6].mxu0 }
 0x543   :  { %v527_v38 = vmul.f32 %v1558_v35, %v1353_v36  ;;  %v515_v40 = vpop.f32.mrb[7].mxu0 }
 0x544   :  { %v526_v41 = vmul.f32 %v1560_v37, %v515_v40  ;;  %v795_v40 = vld [vmem:[%s1910_s2 + $0x98] sm:$0xff] }
 0x545   :  { %v533_v42 = vadd.f32 %v531_v33, %v527_v38 }
 0x546   :  { %v532_v44 = vadd.f32 %v531_v33, %v526_v41  ;;  %v796_v41 = vld [vmem:[%s1910_s2 + $0xa0] sm:$0xff] }
 0x547   :  { %v539_v45 = vmul.f32 %v537_v39, %v533_v42 }
 0x548   :  { %v538_v47 = vmul.f32 %v537_v39, %v532_v44  ;;  %v794_v39 = vld [vmem:[%s1910_s2 + $0x90] sm:$0xff] }
 0x549   :  { %v545_v48 = vadd.f32 %v543_v43, %v539_v45  ;;  %v1484_v42 = vpack.c.bf16 %v795_v40, %v794_v39  ;;  %v31_v39 = vld [vmem:[%s1910_s2 + $0xe8] sm:$0xff] }
 0x54a   :  { %v544_v49 = vadd.f32 %v543_v43, %v538_v47  ;;  %v797_v43 = vld [vmem:[%s1910_s2 + $0xa8] sm:$0xff] }
 0x54b   :  { %v547_v51 = vmax.f32 %v545_v48, 0.0  ;;  %v1488_v44 = vpack.c.bf16 %v797_v43, %v796_v41  ;;  %1485 = vmatprep.subr.bf16.mxu0 %v1484_v42  ;;  %v32_v43 = vld [vmem:[%s1910_s2 + $0xf0] sm:$0xff] }
 0x54c   :  { %v546_v50 = vmax.f32 %v544_v49, 0.0 }
 0x54e   :  { %1362 = vmatprep.mubr.msk.f32.mxu0 %vm111_vm1, %v546_v50 }
 0x54f   :  { %1363 = vmatmul.mubr.msk.f32.vlgmr.msra.gmra.mrb[8].mxu0 %vm111_vm1, %v547_v51 }
 0x550   :  { %1487 = vmatpush3.bf16.msra.mxu0 %v1484_v42 }
 0x551   :  { %1489 = vmatprep.subr.bf16.mxu0 %v1488_v44 }
 0x554   :  { %1491 = vmatpush3.bf16.msra.mxu0 %v1488_v44  ;;  %v33_v44 = vld [vmem:[%s1910_s2 + $0xf8] sm:$0xff] }
 0x622   :  { %v1364_v54 = vpop.f32.mrb[8].mxu0 }
 0x623   :  { %v634_v55 = vadd.f32 %v1364_v54, %v555_v53  ;;  %v628_v56 = vpop.f32.mrb[9].mxu0 }
 0x624   :  { %v629_v57 = vadd.f32 %v628_v56, %v555_v53 }
 0x625   :  { %1561 = vtanh.f32 %v634_v55  ;;  %v801_v55 = vrot.slane %v1733_v52, %v536_v32 }
 0x626   :  { %1563 = vtanh.f32 %v629_v57 }
 0x62f   :  { %v1562_v61 = vpop.eup %1561 }
 0x630   :  { %v1564_v62 = vpop.eup %1563  ;;  %v644_v63 = vmul.f32 %v1562_v61, %v1740_v59 }
 0x631   :  { %v643_v46 = vmul.f32 %v1564_v62, %v1740_v59 }
 0x632   :  { %v650_v2 = vadd.f32 %v1744_v60, %v644_v63 }
 0x633   :  { %v649_v3 = vadd.f32 %v1744_v60, %v643_v46 }
 0x634   :  { %655 = vrot.lane.b32.xlu1 %v650_v2, %s1604_s20 }
 0x635   :  { %653 = vrot.lane.b32.xlu0 %v649_v3, %s1604_s20 }
 0x6a6   :  { %v656_v4 = vpop.permute.xlu1 %655 }
 0x6a7   :  { %v654_v5 = vpop.permute.xlu0 %653  ;;  %v660_v26 = vmul.f32 %v656_v4, %v650_v2 }
 0x6a8   :  { %v659_v6 = vmul.f32 %v654_v5, %v649_v3 }
 0x6aa   :  { %1565 = vtanh.f32 %v659_v6 }
 0x6ab   :  { %1567 = vtanh.f32 %v660_v26 }
 0x6b4   :  { %v1566_v10 = vpop.eup %1565 }
 0x6b5   :  { %665 = vrot.lane.b32.xlu0 %v1566_v10, %s1605_s24  ;;  %v1568_v11 = vpop.eup %1567  ;;  %v1492_v10 = vpack.c.bf16 %v916_v8, %v915_v7 }
 0x6b7   :  { %1493 = vmatprep.subr.bf16.mxu1 %v1492_v10 }
 0x6b9   :  { %667 = vrot.lane.b32.xlu0 %v1568_v11, %s1605_s24  ;;  %v918_v11 = vld [vmem:[%s1910_s2 + $0xc8] sm:$0xff] }
 0x6ba   :  { %v1496_v12 = vpack.c.bf16 %v918_v11, %v917_v9  ;;  %v46_v9 = vld [vmem:[%s1910_s2 + $0x160] sm:$0xff] }
 0x727   :  { %v666_v1 = vpop.permute.xlu0 %665 }
 0x728   :  { %v671_v15 = vmul.f32 %v666_v1, %v649_v3 }
 0x72a   :  { %683 = vrot.lane.b32.xlu0 %v671_v15, %s1606_s28 }
 0x72b   :  { %v668_v0 = vpop.permute.xlu0 %667 }
 0x72c   :  { %v672_v16 = vmul.f32 %v668_v0, %v650_v2 }
 0x72e   :  { %685 = vrot.lane.b32.xlu1 %v672_v16, %s1606_s28 }
 0x79c   :  { %v684_v17 = vpop.permute.xlu0 %683 }
 0x79d   :  { %1373 = vmatprep.mubr.msk.f32.mxu1 %vm111_vm1, %v684_v17 }
 0x7a0   :  { %v686_v18 = vpop.permute.xlu1 %685 }
 0x7a1   :  { %1374 = vmatmul.mubr.msk.f32.vlgmr.msra.gmra.mrb[0].mxu1 %vm111_vm1, %v686_v18 }
 0x7a2   :  { %1495 = vmatpush3.bf16.msra.mxu1 %v1492_v10  ;;  %v47_v10 = vld [vmem:[%s1910_s2 + $0x168] sm:$0xff] }
 0x7a3   :  { %1497 = vmatprep.subr.bf16.mxu1 %v1496_v12  ;;  %v1536_v11 = vpack.c.bf16 %v47_v10, %v46_v9 }
 0x7a6   :  { %1499 = vmatpush3.bf16.msra.mxu1 %v1496_v12  ;;  %v1038_v12 = vsub.s32 5, %v1661_v25 }
 0x874   :  { %v1375_v20 = vpop.f32.mrb[0].mxu1 }
 0x875   :  { %v763_v21 = vadd.f32 %v1375_v20, %v680_v19  ;;  %v757_v22 = vpop.f32.mrb[1].mxu1 }
 0x876   :  { %v758_v23 = vadd.f32 %v757_v22, %v680_v19  ;;  %v922_v19 = vrot.slane %v1733_v52, %v542_v34 }
 0x877   :  { %1569 = vtanh.f32 %v763_v21 }
 0x878   :  { %1571 = vtanh.f32 %v758_v23 }
 0x881   :  { %v1570_v24 = vpop.eup %1569 }
 0x882   :  { %v1572_v28 = vpop.eup %1571  ;;  %v769_v29 = vmul.f32 %v1570_v24, %v1740_v59 }
 0x883   :  { %v768_v30 = vmul.f32 %v1572_v28, %v1740_v59 }
 0x884   :  { %v771_v33 = vadd.f32 %v769_v29, %v1744_v60 }
 0x885   :  { %v770_v35 = vadd.f32 %v768_v30, %v1744_v60 }
 0x886   :  { %776 = vrot.lane.b32.xlu1 %v771_v33, %s1604_s20 }
 0x887   :  { %774 = vrot.lane.b32.xlu0 %v770_v35, %s1604_s20 }
 0x8f8   :  { %v777_v31 = vpop.permute.xlu1 %776 }
 0x8f9   :  { %v781_v36 = vmul.f32 %v777_v31, %v771_v33  ;;  %v775_v37 = vpop.permute.xlu0 %774 }
 0x8fa   :  { %v780_v38 = vmul.f32 %v775_v37, %v770_v35  ;;  %v28_v37 = vld [vmem:[%s1910_s2 + $0xd0] sm:$0xff] }
 0x8fb   :  { %1573 = vtanh.f32 %v781_v36 }
 0x8fc   :  { %1575 = vtanh.f32 %v780_v38 }
 0x905   :  { %v1574_v45 = vpop.eup %1573 }
 0x906   :  { %v1576_v47 = vpop.eup %1575  ;;  %788 = vrot.lane.b32.xlu1 %v1574_v45, %s1605_s24  ;;  %v34_v45 = vld [vmem:[%s1910_s2 + $0x100] sm:$0xff] }
 0x907   :  { %786 = vrot.lane.b32.xlu0 %v1576_v47, %s1605_s24  ;;  %v1508_v47 = vpack.c.bf16 %v33_v44, %v32_v43 }
 0x909   :  { %1509 = vmatprep.subr.bf16.mxu1 %v1508_v47 }
 0x978   :  { %v789_v48 = vpop.permute.xlu1 %788 }
 0x979   :  { %v793_v49 = vmul.f32 %v789_v48, %v771_v33  ;;  %v787_v50 = vpop.permute.xlu0 %786  ;;  %v35_v48 = vld [vmem:[%s1910_s2 + $0x108] sm:$0xff] }
 0x97a   :  { %v792_v51 = vmul.f32 %v787_v50, %v770_v35  ;;  %v36_v50 = vld [vmem:[%s1910_s2 + $0x110] sm:$0xff] }
 0x97b   :  { %806 = vrot.lane.b32.xlu1 %v793_v49, %s1606_s28  ;;  %v1512_v49 = vpack.c.bf16 %v35_v48, %v34_v45 }
 0x97c   :  { %804 = vrot.lane.b32.xlu0 %v792_v51, %s1606_s28  ;;  %v37_v51 = vld [vmem:[%s1910_s2 + $0x118] sm:$0xff] }
 0x9ed   :  { %v807_v54 = vpop.permute.xlu1 %806 }
 0x9ee   :  { %v805_v53 = vpop.permute.xlu0 %804 }
 0x9ef   :  { %1384 = vmatprep.mubr.msk.f32.mxu0 %vm111_vm1, %v805_v53  ;;  %v1516_v53 = vpack.c.bf16 %v37_v51, %v36_v50 }
 0x9f0   :  { %1385 = vmatmul.mubr.msk.f32.vlgmr.msra.gmra.mrb[10].mxu0 %vm111_vm1, %v807_v54  ;;  %v38_v54 = vld [vmem:[%s1910_s2 + $0x120] sm:$0xff] }
 0xac3   :  { %v1386_v56 = vpop.f32.mrb[10].mxu0 }
 0xac4   :  { %v884_v57 = vadd.f32 %v1386_v56, %v801_v55  ;;  %v878_v58 = vpop.f32.mrb[11].mxu0 }
 0xac5   :  { %v879_v61 = vadd.f32 %v878_v58, %v801_v55  ;;  %v39_v55 = vld [vmem:[%s1910_s2 + $0x128] sm:$0xff] }
 0xac6   :  { %1577 = vtanh.f32 %v884_v57 }
 0xac7   :  { %1579 = vtanh.f32 %v879_v61  ;;  %v1520_v61 = vpack.c.bf16 %v39_v55, %v38_v54 }
 0xad0   :  { %v1578_v62 = vpop.eup %1577 }
 0xad1   :  { %v1580_v63 = vpop.eup %1579  ;;  %v890_v46 = vmul.f32 %v1578_v62, %v1740_v59 }
 0xad2   :  { %v889_v2 = vmul.f32 %v1580_v63, %v1740_v59  ;;  %v40_v63 = vld [vmem:[%s1910_s2 + $0x130] sm:$0xff] }
 0xad3   :  { %v892_v3 = vadd.f32 %v890_v46, %v1744_v60  ;;  %v41_v46 = vld [vmem:[%s1910_s2 + $0x138] sm:$0xff] }
 0xad4   :  { %v891_v4 = vadd.f32 %v889_v2, %v1744_v60  ;;  %v1524_v2 = vpack.c.bf16 %v41_v46, %v40_v63 }
 0xad5   :  { %897 = vrot.lane.b32.xlu1 %v892_v3, %s1604_s20 }
 0xad6   :  { %895 = vrot.lane.b32.xlu0 %v891_v4, %s1604_s20 }
 0xb47   :  { %v898_v32 = vpop.permute.xlu1 %897 }
 0xb48   :  { %v902_v5 = vmul.f32 %v898_v32, %v892_v3  ;;  %v896_v6 = vpop.permute.xlu0 %895 }
 0xb49   :  { %v901_v26 = vmul.f32 %v896_v6, %v891_v4  ;;  %v45_v6 = vld [vmem:[%s1910_s2 + $0x158] sm:$0xff] }
 0xb4a   :  { %1581 = vtanh.f32 %v902_v5  ;;  %v44_v5 = vld [vmem:[%s1910_s2 + $0x150] sm:$0xff] }
 0xb4b   :  { %1583 = vtanh.f32 %v901_v26  ;;  %v1532_v26 = vpack.c.bf16 %v45_v6, %v44_v5 }
 0xb54   :  { %v1582_v13 = vpop.eup %1581 }
 0xb55   :  { %v1584_v14 = vpop.eup %1583  ;;  %909 = vrot.lane.b32.xlu1 %v1582_v13, %s1605_s24  ;;  %v1039_v13 = vrot.slane %v1669_v27, %v1038_v12 }
 0xb56   :  { %907 = vrot.lane.b32.xlu0 %v1584_v14, %s1605_s24 }
 0xbc7   :  { %v910_v1 = vpop.permute.xlu1 %909 }
 0xbc8   :  { %v914_v15 = vmul.f32 %v910_v1, %v892_v3  ;;  %v908_v0 = vpop.permute.xlu0 %907  ;;  %v42_v3 = vld [vmem:[%s1910_s2 + $0x140] sm:$0xff] }
 0xbc9   :  { %v913_v16 = vmul.f32 %v908_v0, %v891_v4  ;;  %v43_v4 = vld [vmem:[%s1910_s2 + $0x148] sm:$0xff] }
 0xbca   :  { %927 = vrot.lane.b32.xlu1 %v914_v15, %s1606_s28  ;;  %v1528_v32 = vpack.c.bf16 %v43_v4, %v42_v3 }
 0xbcb   :  { %925 = vrot.lane.b32.xlu0 %v913_v16, %s1606_s28 }
 0xc3c   :  { %v928_v18 = vpop.permute.xlu1 %927 }
 0xc3d   :  { %v926_v17 = vpop.permute.xlu0 %925 }
 0xc3e   :  { %1395 = vmatprep.mubr.msk.f32.mxu1 %vm111_vm1, %v926_v17 }
 0xc3f   :  { %1396 = vmatmul.mubr.msk.f32.vlgmr.msra.gmra.mrb[2].mxu1 %vm111_vm1, %v928_v18  ;;  %v1129_v18 = vsub.s32 6, %v1661_v25 }
 0xc40   :  { %1511 = vmatpush3.bf16.msra.mxu1 %v1508_v47 }
 0xc41   :  { %1513 = vmatprep.subr.bf16.mxu1 %v1512_v49 }
 0xc44   :  { %1515 = vmatpush3.bf16.msra.mxu1 %v1512_v49 }
 0xc45   :  { %1517 = vmatprep.subr.bf16.mxu1 %v1516_v53 }
 0xc48   :  { %1519 = vmatpush3.bf16.msra.mxu1 %v1516_v53 }
 0xc49   :  { %1521 = vmatprep.subr.bf16.mxu1 %v1520_v61 }
 0xc4c   :  { %1523 = vmatpush3.bf16.msra.mxu1 %v1520_v61 }
 0xc4d   :  { %1525 = vmatprep.subr.bf16.mxu1 %v1524_v2 }
 0xc50   :  { %1527 = vmatpush3.bf16.msra.mxu1 %v1524_v2 }
 0xc51   :  { %1529 = vmatprep.subr.bf16.mxu1 %v1528_v32 }
 0xc54   :  { %1531 = vmatpush3.bf16.msra.mxu1 %v1528_v32 }
 0xc55   :  { %1533 = vmatprep.subr.bf16.mxu1 %v1532_v26 }
 0xc58   :  { %1535 = vmatpush3.bf16.msra.mxu1 %v1532_v26 }
 0xc59   :  { %1537 = vmatprep.subr.bf16.mxu1 %v1536_v11 }
 0xc5c   :  { %1539 = vmatpush3.bf16.msra.mxu1 %v1536_v11 }
 0xd12   :  { %v1397_v20 = vpop.f32.mrb[2].mxu1 }
 0xd13   :  { %v1005_v21 = vadd.f32 %v1397_v20, %v922_v19  ;;  %v999_v22 = vpop.f32.mrb[3].mxu1 }
 0xd14   :  { %v1000_v23 = vadd.f32 %v999_v22, %v922_v19  ;;  %v1130_v19 = vrot.slane %v1669_v27, %v1129_v18 }
 0xd15   :  { %1585 = vtanh.f32 %v1005_v21 }
 0xd16   :  { %1587 = vtanh.f32 %v1000_v23 }
 0xd1f   :  { %v1586_v24 = vpop.eup %1585 }
 0xd20   :  { %v1588_v28 = vpop.eup %1587  ;;  %v1011_v29 = vmul.f32 %v1586_v24, %v1740_v59 }
 0xd21   :  { %v1010_v30 = vmul.f32 %v1588_v28, %v1740_v59  ;;  %v29_v59 = vld [vmem:[%s1910_s2 + $0xd8] sm:$0xff] }
 0xd22   :  { %v1013_v33 = vadd.f32 %v1011_v29, %v1744_v60  ;;  %v1500_v38 = vpack.c.bf16 %v29_v59, %v28_v37 }
 0xd23   :  { %v1012_v35 = vadd.f32 %v1010_v30, %v1744_v60  ;;  %v30_v60 = vld [vmem:[%s1910_s2 + $0xe0] sm:$0xff] }
 0xd24   :  { %1018 = vrot.lane.b32.xlu1 %v1013_v33, %s1604_s20  ;;  %v1504_v40 = vpack.c.bf16 %v31_v39, %v30_v60  ;;  %1501 = vmatprep.subr.bf16.mxu0 %v1500_v38 }
 0xd25   :  { %1016 = vrot.lane.b32.xlu0 %v1012_v35, %s1604_s20  ;;  %1503 = vmatpush3.bf16.msra.mxu0 %v1500_v38 }
 0xd26   :  { %1505 = vmatprep.subr.bf16.mxu0 %v1504_v40 }
 0xd29   :  { %1507 = vmatpush3.bf16.msra.mxu0 %v1504_v40 }
 0xd96   :  { %v1019_v34 = vpop.permute.xlu1 %1018 }
 0xd97   :  { %v1023_v52 = vmul.f32 %v1019_v34, %v1013_v33  ;;  %v1017_v31 = vpop.permute.xlu0 %1016 }
 0xd98   :  { %v1022_v36 = vmul.f32 %v1017_v31, %v1012_v35 }
 0xd99   :  { %1589 = vtanh.f32 %v1023_v52 }
 0xd9a   :  { %1591 = vtanh.f32 %v1022_v36 }
 0xda3   :  { %v1590_v41 = vpop.eup %1589 }
 0xda4   :  { %v1592_v42 = vpop.eup %1591  ;;  %1030 = vrot.lane.b32.xlu1 %v1590_v41, %s1605_s24 }
 0xda5   :  { %1028 = vrot.lane.b32.xlu0 %v1592_v42, %s1605_s24 }
 0xe16   :  { %v1031_v56 = vpop.permute.xlu1 %1030 }
 0xe17   :  { %v1035_v57 = vmul.f32 %v1031_v56, %v1013_v33  ;;  %v1029_v58 = vpop.permute.xlu0 %1028 }
 0xe18   :  { %v1034_v62 = vmul.f32 %v1029_v58, %v1012_v35 }
 0xe19   :  { %1044 = vrot.lane.b32.xlu1 %v1035_v57, %s1606_s28 }
 0xe1a   :  { %1042 = vrot.lane.b32.xlu0 %v1034_v62, %s1606_s28 }
 0xe8b   :  { %v1045_v8 = vpop.permute.xlu1 %1044 }
 0xe8c   :  { %v1043_v7 = vpop.permute.xlu0 %1042 }
 0xe8d   :  { %1406 = vmatprep.mubr.msk.f32.mxu0 %vm111_vm1, %v1043_v7 }
 0xe8e   :  { %1407 = vmatmul.mubr.msk.f32.vlgmr.msra.gmra.mrb[12].mxu0 %vm111_vm1, %v1045_v8 }
 0xf61   :  { %v1408_v14 = vpop.f32.mrb[12].mxu0 }
 0xf62   :  { %v1122_v1 = vadd.f32 %v1408_v14, %v1039_v13  ;;  %v1116_v15 = vpop.f32.mrb[13].mxu0 }
 0xf63   :  { %v1117_v0 = vadd.f32 %v1116_v15, %v1039_v13 }
 0xf64   :  { %v1126_v17 = vmax.f32 %v1122_v1, 0.0 }
 0xf65   :  { %v1125_v16 = vmax.f32 %v1117_v0, 0.0 }
 0xf67   :  { %1441 = vmatprep.mubr.f32.mxu1 %v1125_v16 }
 0xf68   :  { %1442 = vmatmul.mubr.f32.vlgmr.msra.gmra.mrb[4].mxu1 %v1126_v17 }
0x103b   :  { %v1443_v20 = vpop.f32.mrb[4].mxu1 }
0x103c   :  { %v1203_v21 = vadd.f32 %v1443_v20, %v1130_v19  ;;  %v1197_v22 = vpop.f32.mrb[5].mxu1 }
0x103d   :  { %v1198_v23 = vadd.f32 %v1197_v22, %v1130_v19 }
0x103e   :  { %1208 = vmax.xlane.f32.xlu1 %v1203_v21 }
0x103f   :  { %1206 = vmax.xlane.f32.xlu0 %v1198_v23 }
0x10cb   :  { %v1209_v24 = vpop.xlane.xlu1 %1208 }
0x10cc   :  { %v1207_v28 = vpop.xlane.xlu0 %1206  ;;  %v1211_v29 = vsub.f32 %v1203_v21, %v1209_v24 }
0x10cd   :  { %v1210_v30 = vsub.f32 %v1198_v23, %v1207_v28 }
0x10ce   :  { %v1214_v35 = vmul.f32 1.442695, %v1211_v29 }
0x10cf   :  { %v1212_v33 = vmul.f32 1.442695, %v1210_v30 }
0x10d1   :  { %1593 = vpow2.f32 %v1212_v33 }
0x10d2   :  { %1595 = vpow2.f32 %v1214_v35 }
0x10db   :  { %v1594_v34 = vpop.eup %1593 }
0x10dc   :  { %1216 = vadd.xlane.f32.xlu0 %v1594_v34  ;;  %v1596_v52 = vpop.eup %1595 }
0x10e0   :  { %1218 = vadd.xlane.f32.xlu0 %v1596_v52 }
0x1169   :  { %v1217_v25 = vpop.xlane.xlu0 %1216 }
0x116a   :  { %1597 = vlog2.f32 %v1217_v25 }
0x116d   :  { %v1219_v27 = vpop.xlane.xlu0 %1218 }
0x116e   :  { %1599 = vlog2.f32 %v1219_v27 }
0x1174   :  { %v1598_v31 = vpop.eup %1597 }
0x1175   :  { %v1221_v36 = vmul.f32 0.6931472, %v1598_v31 }
0x1177   :  { %v1224_v37 = vsub.f32 %v1210_v30, %v1221_v36 }
0x1178   :  { %v1600_v59 = vpop.eup %1599 }
0x1179   :  { %1226 = vst [vmem:[%s1912_s3] sm:$0xff] %v1224_v37  ;;  %v1223_v60 = vmul.f32 0.6931472, %v1600_v59 }
0x117b   :  { %v1225_v38 = vsub.f32 %v1211_v29, %v1223_v60 }
0x117d   :  { %1227 = vst [vmem:[%s1912_s3 + $0x8] sm:$0xff] %v1225_v38 }

</bundles_post_ra>
